<compile_context>
chip_gen: v7x
topology: tpu7x:2x2x1
jax: 0.10.0
libtpu: 0.0.40
codegen_flags: <defaults>
</compile_context>

<pallas_src>
import jax
import jax.numpy as jnp
import numpy as np
from jax.experimental import pallas as pl
from jax.experimental.pallas import tpu as pltpu

NUM_BRANCHES = 4
BN_EPS = 1e-5


# ----------------------------------------------------------------------------
# Kernel: one batch tile, four per-branch MLPs + per-branch output-head slice.
# ----------------------------------------------------------------------------
def local_classifier_kernel(le_ref, re_ref, no_ref, mo_ref,
                            w1_ref, b1_ref, w2_ref, b2_ref, wo_ref, bo_ref,
                            out_ref):
    """
    le/re/no/mo_ref : (TB, D)    per-branch activations (batch tile, f32/bf16)
    w1_ref : (4, D, H1)          BN-folded layer-1 weights, stacked per branch
    b1_ref : (4, 1, H1)
    w2_ref : (4, H1, H2)         BN-folded layer-2 weights, stacked per branch
    b2_ref : (4, 1, H2)
    wo_ref : (4, 1, H2)          per-branch slice of the output-head weight row
    bo_ref : (1,)                output-head bias (SMEM scalar)
    out_ref: (TB, 1)             f32 probabilities
    """
    branches = (le_ref, re_ref, no_ref, mo_ref)
    tb = out_ref.shape[0]
    logit = jnp.zeros((tb, 1), jnp.float32)
    for br in range(NUM_BRANCHES):                      # static, 4 iterations
        x = branches[br][...].astype(jnp.float32)
        # Layer 1 (BN folded) + ReLU.
        h = jnp.dot(x, w1_ref[br], preferred_element_type=jnp.float32) + b1_ref[br]
        h = jnp.maximum(h, 0.0)
        # Layer 2 (BN folded) + ReLU.
        h = jnp.dot(h, w2_ref[br], preferred_element_type=jnp.float32) + b2_ref[br]
        h = jnp.maximum(h, 0.0)
        # This branch's contribution to the output head: VPU multiply + lane
        # reduction (no N=1 matmul, no concatenation of branch features).
        logit = logit + jnp.sum(h * wo_ref[br], axis=-1, keepdims=True)
    out_ref[...] = jax.nn.sigmoid(logit + bo_ref[0]).astype(out_ref.dtype)


# ----------------------------------------------------------------------------
# Wrapper
# ----------------------------------------------------------------------------
def _round_up(x, m):
    return ((x + m - 1) // m) * m


def _pick_batch_tile(B, batch_tile):
    """Sublane-aligned batch tile: <= batch_tile, >= 2 grid steps when the
    batch allows it (v7x megacore), preferring a tile that divides B exactly
    so the padding copy is skipped."""
    n_steps = max(2, pl.cdiv(B, batch_tile))
    tb = min(batch_tile, max(8, _round_up(pl.cdiv(B, n_steps), 8)))
    if B % tb != 0:
        # Look for a nearby divisor of B (multiple of 8); don't shrink below
        # tb // 2 so per-step overhead stays bounded.
        for cand in range(tb - 8, max(tb // 2, 8) - 1, -8):
            if B % cand == 0:
                return cand
    return tb


def local_classifier_forward(left_eye, right_eye, nose, mouth, packed_params,
                             *, batch_tile=512):
    """Inputs: four (B, D) arrays (f32 or bf16). Returns (B, 1) f32 probs."""
    w1, b1, w2, b2, wo, bo = packed_params
    B, D = left_eye.shape
    H1 = w1.shape[2]
    H2 = w2.shape[2]

    TB = _pick_batch_tile(B, batch_tile)
    grid = pl.cdiv(B, TB)
    Bp = grid * TB
    if Bp != B:
        # TODO(synk): masked trailing tile would avoid this extra copy pass.
        pad = ((0, Bp - B), (0, 0))
        left_eye = jnp.pad(left_eye, pad)
        right_eye = jnp.pad(right_eye, pad)
        nose = jnp.pad(nose, pad)
        mouth = jnp.pad(mouth, pad)

    act_spec = pl.BlockSpec((TB, D), lambda i: (i, 0))   # streamed over batch

    out = pl.pallas_call(
        local_classifier_kernel,
        out_shape=jax.ShapeDtypeStruct((Bp, 1), jnp.float32),
        grid=(grid,),
        in_specs=[
            act_spec, act_spec, act_spec, act_spec,                    # activations
            pl.BlockSpec((NUM_BRANCHES, D, H1), lambda i: (0, 0, 0)),  # VMEM-resident weights
            pl.BlockSpec((NUM_BRANCHES, 1, H1), lambda i: (0, 0, 0)),
            pl.BlockSpec((NUM_BRANCHES, H1, H2), lambda i: (0, 0, 0)),
            pl.BlockSpec((NUM_BRANCHES, 1, H2), lambda i: (0, 0, 0)),
            pl.BlockSpec((NUM_BRANCHES, 1, H2), lambda i: (0, 0, 0)),
            pl.BlockSpec(memory_space=pltpu.MemorySpace.SMEM),         # scalar head bias
        ],
        out_specs=pl.BlockSpec((TB, 1), lambda i: (i, 0)),
        compiler_params=pltpu.CompilerParams(
            dimension_semantics=("parallel",)),
    )(left_eye, right_eye, nose, mouth, w1, b1, w2, b2, wo, bo)
    return out[:B]


# ----------------------------------------------------------------------------
# Parameter construction (raw per-branch params) and host-side packing.
# ----------------------------------------------------------------------------
def init_raw_params(key, token_dim):
    """Deterministic synthetic parameters matching the module's shapes.
    Linear weights stored as (in, out) (PyTorch weight transposed)."""
    D = token_dim
    H1, H2 = D // 2, D // 4
    keys = iter(jax.random.split(key, 16))

    def u(shape, lo=-0.1, hi=0.1):
        return jax.random.uniform(next(keys), shape, jnp.float32, lo, hi)

    raw = dict(
        W1=u((NUM_BRANCHES, D, H1)), b1=u((NUM_BRANCHES, H1)),
        g1=1.0 + u((NUM_BRANCHES, H1)), be1=u((NUM_BRANCHES, H1)),
        m1=u((NUM_BRANCHES, H1)), v1=1.0 + u((NUM_BRANCHES, H1), 0.0, 0.5),
        W2=u((NUM_BRANCHES, H1, H2)), b2=u((NUM_BRANCHES, H2)),
        g2=1.0 + u((NUM_BRANCHES, H2)), be2=u((NUM_BRANCHES, H2)),
        m2=u((NUM_BRANCHES, H2)), v2=1.0 + u((NUM_BRANCHES, H2), 0.0, 0.5),
        Wo=u((D, 1)), bo=u((1,)),
    )
    return raw


def pack_params(raw):
    """Host-side (one-time) BN folding into the per-branch linears."""
    H2 = raw["W2"].shape[2]

    s1 = raw["g1"] / jnp.sqrt(raw["v1"] + BN_EPS)          # (4, H1)
    t1 = raw["be1"] - raw["m1"] * s1
    W1f = raw["W1"] * s1[:, None, :]                       # (4, D, H1)
    b1f = (raw["b1"] * s1 + t1)[:, None, :]                # (4, 1, H1)

    s2 = raw["g2"] / jnp.sqrt(raw["v2"] + BN_EPS)          # (4, H2)
    t2 = raw["be2"] - raw["m2"] * s2
    W2f = raw["W2"] * s2[:, None, :]                       # (4, H1, H2)
    b2f = (raw["b2"] * s2 + t2)[:, None, :]                # (4, 1, H2)

    # Output head split per branch (matches torch.cat branch order).
    wo = raw["Wo"].reshape(NUM_BRANCHES, 1, H2)            # (4, 1, H2)
    bo = raw["bo"]                                         # (1,)
    return (W1f, b1f, W2f, b2f, wo, bo)


# ----------------------------------------------------------------------------
# Pure-JAX reference (mirrors eval-mode PyTorch forward, UNFOLDED params).
# ----------------------------------------------------------------------------
def ref_forward(left_eye, right_eye, nose, mouth, raw):
    inputs = [left_eye, right_eye, nose, mouth]
    feats = []
    for br in range(NUM_BRANCHES):
        x = inputs[br]
        h = x @ raw["W1"][br] + raw["b1"][br]
        h = (h - raw["m1"][br]) / jnp.sqrt(raw["v1"][br] + BN_EPS) * raw["g1"][br] + raw["be1"][br]
        h = jnp.maximum(h, 0.0)
        h = h @ raw["W2"][br] + raw["b2"][br]
        h = (h - raw["m2"][br]) / jnp.sqrt(raw["v2"][br] + BN_EPS) * raw["g2"][br] + raw["be2"][br]
        h = jnp.maximum(h, 0.0)
        feats.append(h)
    cat = jnp.concatenate(feats, axis=-1)
    return jax.nn.sigmoid(cat @ raw["Wo"] + raw["bo"])


if __name__ == "__main__":
    TOKEN_DIM = 32   # branch hidden dims are 16 and 8

    key = jax.random.PRNGKey(0)
    k_params, k_le, k_re, k_no, k_mo = jax.random.split(key, 5)
    raw = init_raw_params(k_params, TOKEN_DIM)
    packed = pack_params(raw)

    # --- small batch (single grid step, no padding) ---
    B = 8
    le = jax.random.normal(k_le, (B, TOKEN_DIM), jnp.float32)
    re = jax.random.normal(k_re, (B, TOKEN_DIM), jnp.float32)
    no = jax.random.normal(k_no, (B, TOKEN_DIM), jnp.float32)
    mo = jax.random.normal(k_mo, (B, TOKEN_DIM), jnp.float32)

    out = jax.block_until_ready(local_classifier_forward(le, re, no, mo, packed))
    ref = jax.block_until_ready(ref_forward(le, re, no, mo, raw))
    np.testing.assert_allclose(np.asarray(out), np.asarray(ref), rtol=1e-5, atol=1e-5)
    assert out.shape == (B, 1)

    # --- multi-step grid (>= 2 steps for v7x megacore) + padded remainder ---
    B2 = 300
    keys2 = list(jax.random.split(jax.random.PRNGKey(1), 4))
    le2, re2, no2, mo2 = [jax.random.normal(k, (B2, TOKEN_DIM), jnp.float32) for k in keys2]
    out2 = jax.block_until_ready(local_classifier_forward(le2, re2, no2, mo2, packed))
    ref2 = jax.block_until_ready(ref_forward(le2, re2, no2, mo2, raw))
    np.testing.assert_allclose(np.asarray(out2), np.asarray(ref2), rtol=1e-5, atol=1e-5)
    assert out2.shape == (B2, 1)

    # --- bf16 activation streaming (halves HBM bytes on the streamed input) ---
    le_b, re_b, no_b, mo_b = (a.astype(jnp.bfloat16) for a in (le, re, no, mo))
    out_b = jax.block_until_ready(local_classifier_forward(le_b, re_b, no_b, mo_b, packed))
    ref_b = jax.block_until_ready(ref_forward(
        le_b.astype(jnp.float32), re_b.astype(jnp.float32),
        no_b.astype(jnp.float32), mo_b.astype(jnp.float32), raw))
    np.testing.assert_allclose(np.asarray(out_b), np.asarray(ref_b), rtol=2e-2, atol=2e-2)

    print("KERNEL_OK")
</pallas_src>

<mosaic_0001>
module attributes {stable_mosaic.version = 11 : i64} {
  func.func @local_classifier_kernel(%arg0: i32, %arg1: memref<8x32xf32, #tpu.memory_space<vmem>>, %arg2: memref<8x32xf32, #tpu.memory_space<vmem>>, %arg3: memref<8x32xf32, #tpu.memory_space<vmem>>, %arg4: memref<8x32xf32, #tpu.memory_space<vmem>>, %arg5: memref<4x32x16xf32, #tpu.memory_space<vmem>>, %arg6: memref<4x1x16xf32, #tpu.memory_space<vmem>>, %arg7: memref<4x16x8xf32, #tpu.memory_space<vmem>>, %arg8: memref<4x1x8xf32, #tpu.memory_space<vmem>>, %arg9: memref<4x1x8xf32, #tpu.memory_space<vmem>>, %arg10: memref<1xf32, #tpu.memory_space<smem>>, %arg11: memref<8x1xf32, #tpu.memory_space<vmem>>) attributes {dimension_semantics = [#tpu.dimension_semantics<parallel>], iteration_bounds = array<i64: 1>, scalar_prefetch = 0 : i64, scratch_operands = 0 : i64, tpu.core_type = #tpu.core_type<tc>, window_params = [{transform_indices = @transform_0, window_bounds = array<i64: 8, 32>}, {transform_indices = @transform_1, window_bounds = array<i64: 8, 32>}, {transform_indices = @transform_2, window_bounds = array<i64: 8, 32>}, {transform_indices = @transform_3, window_bounds = array<i64: 8, 32>}, {pipeline_mode = #tpu.pipeline_mode<synchronous>, transform_indices = @transform_4, window_bounds = array<i64: 4, 32, 16>}, {pipeline_mode = #tpu.pipeline_mode<synchronous>, transform_indices = @transform_5, window_bounds = array<i64: 4, 1, 16>}, {pipeline_mode = #tpu.pipeline_mode<synchronous>, transform_indices = @transform_6, window_bounds = array<i64: 4, 16, 8>}, {pipeline_mode = #tpu.pipeline_mode<synchronous>, transform_indices = @transform_7, window_bounds = array<i64: 4, 1, 8>}, {pipeline_mode = #tpu.pipeline_mode<synchronous>, transform_indices = @transform_8, window_bounds = array<i64: 4, 1, 8>}, {transform_indices = @transform_9, window_bounds = array<i64: 1>}, {transform_indices = @transform_10, window_bounds = array<i64: 8, 1>}]} {
    %cst = arith.constant 0.000000e+00 : f32
    %0 = vector.broadcast %cst : f32 to vector<8x1xf32>
    %c0 = arith.constant 0 : index
    %c0_0 = arith.constant 0 : index
    %1 = vector.load %arg1[%c0, %c0_0] : memref<8x32xf32, #tpu.memory_space<vmem>>, vector<8x32xf32>
    %c0_1 = arith.constant 0 : index
    %c0_2 = arith.constant 0 : index
    %c0_3 = arith.constant 0 : index
    %2 = vector.load %arg5[%c0_1, %c0_2, %c0_3] : memref<4x32x16xf32, #tpu.memory_space<vmem>>, vector<1x32x16xf32>
    %3 = vector.shape_cast %2 : vector<1x32x16xf32> to vector<32x16xf32>
    %cst_4 = arith.constant dense<0.000000e+00> : vector<8x16xf32>
    %4 = tpu.matmul %1, %3, %cst_4 {dimension_numbers = #tpu.dot_dimension_numbers<[1], [0], [0], [1], [0, 0, 1, 1], [], []>} : vector<8x32xf32>, vector<32x16xf32>, vector<8x16xf32> -> vector<8x16xf32>
    %c0_5 = arith.constant 0 : index
    %c0_6 = arith.constant 0 : index
    %c0_7 = arith.constant 0 : index
    %5 = vector.load %arg6[%c0_5, %c0_6, %c0_7] : memref<4x1x16xf32, #tpu.memory_space<vmem>>, vector<1x1x16xf32>
    %6 = vector.shape_cast %5 : vector<1x1x16xf32> to vector<1x16xf32>
    %7 = vector.broadcast %6 : vector<1x16xf32> to vector<8x16xf32>
    %8 = arith.addf %4, %7 : vector<8x16xf32>
    %cst_8 = arith.constant 0.000000e+00 : f32
    %9 = vector.broadcast %cst_8 : f32 to vector<8x16xf32>
    %10 = arith.maximumf %8, %9 : vector<8x16xf32>
    %c0_9 = arith.constant 0 : index
    %c0_10 = arith.constant 0 : index
    %c0_11 = arith.constant 0 : index
    %11 = vector.load %arg7[%c0_9, %c0_10, %c0_11] : memref<4x16x8xf32, #tpu.memory_space<vmem>>, vector<1x16x8xf32>
    %12 = vector.shape_cast %11 : vector<1x16x8xf32> to vector<16x8xf32>
    %cst_12 = arith.constant dense<0.000000e+00> : vector<8x8xf32>
    %13 = tpu.matmul %10, %12, %cst_12 {dimension_numbers = #tpu.dot_dimension_numbers<[1], [0], [0], [1], [0, 0, 1, 1], [], []>} : vector<8x16xf32>, vector<16x8xf32>, vector<8x8xf32> -> vector<8x8xf32>
    %c0_13 = arith.constant 0 : index
    %c0_14 = arith.constant 0 : index
    %c0_15 = arith.constant 0 : index
    %14 = vector.load %arg8[%c0_13, %c0_14, %c0_15] : memref<4x1x8xf32, #tpu.memory_space<vmem>>, vector<1x1x8xf32>
    %15 = vector.shape_cast %14 : vector<1x1x8xf32> to vector<1x8xf32>
    %16 = vector.broadcast %15 : vector<1x8xf32> to vector<8x8xf32>
    %17 = arith.addf %13, %16 : vector<8x8xf32>
    %cst_16 = arith.constant 0.000000e+00 : f32
    %18 = vector.broadcast %cst_16 : f32 to vector<8x8xf32>
    %19 = arith.maximumf %17, %18 : vector<8x8xf32>
    %c0_17 = arith.constant 0 : index
    %c0_18 = arith.constant 0 : index
    %c0_19 = arith.constant 0 : index
    %20 = vector.load %arg9[%c0_17, %c0_18, %c0_19] : memref<4x1x8xf32, #tpu.memory_space<vmem>>, vector<1x1x8xf32>
    %21 = vector.shape_cast %20 : vector<1x1x8xf32> to vector<1x8xf32>
    %22 = vector.broadcast %21 : vector<1x8xf32> to vector<8x8xf32>
    %23 = arith.mulf %19, %22 : vector<8x8xf32>
    %cst_20 = arith.constant dense<0.000000e+00> : vector<8xf32>
    %24 = vector.multi_reduction <add>, %23, %cst_20 [1] : vector<8x8xf32> to vector<8xf32>
    %25 = vector.shape_cast %24 : vector<8xf32> to vector<8x1xf32>
    %26 = arith.addf %0, %25 : vector<8x1xf32>
    %c0_21 = arith.constant 0 : index
    %c0_22 = arith.constant 0 : index
    %27 = vector.load %arg2[%c0_21, %c0_22] : memref<8x32xf32, #tpu.memory_space<vmem>>, vector<8x32xf32>
    %c1 = arith.constant 1 : index
    %c0_23 = arith.constant 0 : index
    %c0_24 = arith.constant 0 : index
    %28 = vector.load %arg5[%c1, %c0_23, %c0_24] : memref<4x32x16xf32, #tpu.memory_space<vmem>>, vector<1x32x16xf32>
    %29 = vector.shape_cast %28 : vector<1x32x16xf32> to vector<32x16xf32>
    %cst_25 = arith.constant dense<0.000000e+00> : vector<8x16xf32>
    %30 = tpu.matmul %27, %29, %cst_25 {dimension_numbers = #tpu.dot_dimension_numbers<[1], [0], [0], [1], [0, 0, 1, 1], [], []>} : vector<8x32xf32>, vector<32x16xf32>, vector<8x16xf32> -> vector<8x16xf32>
    %c1_26 = arith.constant 1 : index
    %c0_27 = arith.constant 0 : index
    %c0_28 = arith.constant 0 : index
    %31 = vector.load %arg6[%c1_26, %c0_27, %c0_28] : memref<4x1x16xf32, #tpu.memory_space<vmem>>, vector<1x1x16xf32>
    %32 = vector.shape_cast %31 : vector<1x1x16xf32> to vector<1x16xf32>
    %33 = vector.broadcast %32 : vector<1x16xf32> to vector<8x16xf32>
    %34 = arith.addf %30, %33 : vector<8x16xf32>
    %cst_29 = arith.constant 0.000000e+00 : f32
    %35 = vector.broadcast %cst_29 : f32 to vector<8x16xf32>
    %36 = arith.maximumf %34, %35 : vector<8x16xf32>
    %c1_30 = arith.constant 1 : index
    %c0_31 = arith.constant 0 : index
    %c0_32 = arith.constant 0 : index
    %37 = vector.load %arg7[%c1_30, %c0_31, %c0_32] : memref<4x16x8xf32, #tpu.memory_space<vmem>>, vector<1x16x8xf32>
    %38 = vector.shape_cast %37 : vector<1x16x8xf32> to vector<16x8xf32>
    %cst_33 = arith.constant dense<0.000000e+00> : vector<8x8xf32>
    %39 = tpu.matmul %36, %38, %cst_33 {dimension_numbers = #tpu.dot_dimension_numbers<[1], [0], [0], [1], [0, 0, 1, 1], [], []>} : vector<8x16xf32>, vector<16x8xf32>, vector<8x8xf32> -> vector<8x8xf32>
    %c1_34 = arith.constant 1 : index
    %c0_35 = arith.constant 0 : index
    %c0_36 = arith.constant 0 : index
    %40 = vector.load %arg8[%c1_34, %c0_35, %c0_36] : memref<4x1x8xf32, #tpu.memory_space<vmem>>, vector<1x1x8xf32>
    %41 = vector.shape_cast %40 : vector<1x1x8xf32> to vector<1x8xf32>
    %42 = vector.broadcast %41 : vector<1x8xf32> to vector<8x8xf32>
    %43 = arith.addf %39, %42 : vector<8x8xf32>
    %cst_37 = arith.constant 0.000000e+00 : f32
    %44 = vector.broadcast %cst_37 : f32 to vector<8x8xf32>
    %45 = arith.maximumf %43, %44 : vector<8x8xf32>
    %c1_38 = arith.constant 1 : index
    %c0_39 = arith.constant 0 : index
    %c0_40 = arith.constant 0 : index
    %46 = vector.load %arg9[%c1_38, %c0_39, %c0_40] : memref<4x1x8xf32, #tpu.memory_space<vmem>>, vector<1x1x8xf32>
    %47 = vector.shape_cast %46 : vector<1x1x8xf32> to vector<1x8xf32>
    %48 = vector.broadcast %47 : vector<1x8xf32> to vector<8x8xf32>
    %49 = arith.mulf %45, %48 : vector<8x8xf32>
    %cst_41 = arith.constant dense<0.000000e+00> : vector<8xf32>
    %50 = vector.multi_reduction <add>, %49, %cst_41 [1] : vector<8x8xf32> to vector<8xf32>
    %51 = vector.shape_cast %50 : vector<8xf32> to vector<8x1xf32>
    %52 = arith.addf %26, %51 : vector<8x1xf32>
    %c0_42 = arith.constant 0 : index
    %c0_43 = arith.constant 0 : index
    %53 = vector.load %arg3[%c0_42, %c0_43] : memref<8x32xf32, #tpu.memory_space<vmem>>, vector<8x32xf32>
    %c2 = arith.constant 2 : index
    %c0_44 = arith.constant 0 : index
    %c0_45 = arith.constant 0 : index
    %54 = vector.load %arg5[%c2, %c0_44, %c0_45] : memref<4x32x16xf32, #tpu.memory_space<vmem>>, vector<1x32x16xf32>
    %55 = vector.shape_cast %54 : vector<1x32x16xf32> to vector<32x16xf32>
    %cst_46 = arith.constant dense<0.000000e+00> : vector<8x16xf32>
    %56 = tpu.matmul %53, %55, %cst_46 {dimension_numbers = #tpu.dot_dimension_numbers<[1], [0], [0], [1], [0, 0, 1, 1], [], []>} : vector<8x32xf32>, vector<32x16xf32>, vector<8x16xf32> -> vector<8x16xf32>
    %c2_47 = arith.constant 2 : index
    %c0_48 = arith.constant 0 : index
    %c0_49 = arith.constant 0 : index
    %57 = vector.load %arg6[%c2_47, %c0_48, %c0_49] : memref<4x1x16xf32, #tpu.memory_space<vmem>>, vector<1x1x16xf32>
    %58 = vector.shape_cast %57 : vector<1x1x16xf32> to vector<1x16xf32>
    %59 = vector.broadcast %58 : vector<1x16xf32> to vector<8x16xf32>
    %60 = arith.addf %56, %59 : vector<8x16xf32>
    %cst_50 = arith.constant 0.000000e+00 : f32
    %61 = vector.broadcast %cst_50 : f32 to vector<8x16xf32>
    %62 = arith.maximumf %60, %61 : vector<8x16xf32>
    %c2_51 = arith.constant 2 : index
    %c0_52 = arith.constant 0 : index
    %c0_53 = arith.constant 0 : index
    %63 = vector.load %arg7[%c2_51, %c0_52, %c0_53] : memref<4x16x8xf32, #tpu.memory_space<vmem>>, vector<1x16x8xf32>
    %64 = vector.shape_cast %63 : vector<1x16x8xf32> to vector<16x8xf32>
    %cst_54 = arith.constant dense<0.000000e+00> : vector<8x8xf32>
    %65 = tpu.matmul %62, %64, %cst_54 {dimension_numbers = #tpu.dot_dimension_numbers<[1], [0], [0], [1], [0, 0, 1, 1], [], []>} : vector<8x16xf32>, vector<16x8xf32>, vector<8x8xf32> -> vector<8x8xf32>
    %c2_55 = arith.constant 2 : index
    %c0_56 = arith.constant 0 : index
    %c0_57 = arith.constant 0 : index
    %66 = vector.load %arg8[%c2_55, %c0_56, %c0_57] : memref<4x1x8xf32, #tpu.memory_space<vmem>>, vector<1x1x8xf32>
    %67 = vector.shape_cast %66 : vector<1x1x8xf32> to vector<1x8xf32>
    %68 = vector.broadcast %67 : vector<1x8xf32> to vector<8x8xf32>
    %69 = arith.addf %65, %68 : vector<8x8xf32>
    %cst_58 = arith.constant 0.000000e+00 : f32
    %70 = vector.broadcast %cst_58 : f32 to vector<8x8xf32>
    %71 = arith.maximumf %69, %70 : vector<8x8xf32>
    %c2_59 = arith.constant 2 : index
    %c0_60 = arith.constant 0 : index
    %c0_61 = arith.constant 0 : index
    %72 = vector.load %arg9[%c2_59, %c0_60, %c0_61] : memref<4x1x8xf32, #tpu.memory_space<vmem>>, vector<1x1x8xf32>
    %73 = vector.shape_cast %72 : vector<1x1x8xf32> to vector<1x8xf32>
    %74 = vector.broadcast %73 : vector<1x8xf32> to vector<8x8xf32>
    %75 = arith.mulf %71, %74 : vector<8x8xf32>
    %cst_62 = arith.constant dense<0.000000e+00> : vector<8xf32>
    %76 = vector.multi_reduction <add>, %75, %cst_62 [1] : vector<8x8xf32> to vector<8xf32>
    %77 = vector.shape_cast %76 : vector<8xf32> to vector<8x1xf32>
    %78 = arith.addf %52, %77 : vector<8x1xf32>
    %c0_63 = arith.constant 0 : index
    %c0_64 = arith.constant 0 : index
    %79 = vector.load %arg4[%c0_63, %c0_64] : memref<8x32xf32, #tpu.memory_space<vmem>>, vector<8x32xf32>
    %c3 = arith.constant 3 : index
    %c0_65 = arith.constant 0 : index
    %c0_66 = arith.constant 0 : index
    %80 = vector.load %arg5[%c3, %c0_65, %c0_66] : memref<4x32x16xf32, #tpu.memory_space<vmem>>, vector<1x32x16xf32>
    %81 = vector.shape_cast %80 : vector<1x32x16xf32> to vector<32x16xf32>
    %cst_67 = arith.constant dense<0.000000e+00> : vector<8x16xf32>
    %82 = tpu.matmul %79, %81, %cst_67 {dimension_numbers = #tpu.dot_dimension_numbers<[1], [0], [0], [1], [0, 0, 1, 1], [], []>} : vector<8x32xf32>, vector<32x16xf32>, vector<8x16xf32> -> vector<8x16xf32>
    %c3_68 = arith.constant 3 : index
    %c0_69 = arith.constant 0 : index
    %c0_70 = arith.constant 0 : index
    %83 = vector.load %arg6[%c3_68, %c0_69, %c0_70] : memref<4x1x16xf32, #tpu.memory_space<vmem>>, vector<1x1x16xf32>
    %84 = vector.shape_cast %83 : vector<1x1x16xf32> to vector<1x16xf32>
    %85 = vector.broadcast %84 : vector<1x16xf32> to vector<8x16xf32>
    %86 = arith.addf %82, %85 : vector<8x16xf32>
    %cst_71 = arith.constant 0.000000e+00 : f32
    %87 = vector.broadcast %cst_71 : f32 to vector<8x16xf32>
    %88 = arith.maximumf %86, %87 : vector<8x16xf32>
    %c3_72 = arith.constant 3 : index
    %c0_73 = arith.constant 0 : index
    %c0_74 = arith.constant 0 : index
    %89 = vector.load %arg7[%c3_72, %c0_73, %c0_74] : memref<4x16x8xf32, #tpu.memory_space<vmem>>, vector<1x16x8xf32>
    %90 = vector.shape_cast %89 : vector<1x16x8xf32> to vector<16x8xf32>
    %cst_75 = arith.constant dense<0.000000e+00> : vector<8x8xf32>
    %91 = tpu.matmul %88, %90, %cst_75 {dimension_numbers = #tpu.dot_dimension_numbers<[1], [0], [0], [1], [0, 0, 1, 1], [], []>} : vector<8x16xf32>, vector<16x8xf32>, vector<8x8xf32> -> vector<8x8xf32>
    %c3_76 = arith.constant 3 : index
    %c0_77 = arith.constant 0 : index
    %c0_78 = arith.constant 0 : index
    %92 = vector.load %arg8[%c3_76, %c0_77, %c0_78] : memref<4x1x8xf32, #tpu.memory_space<vmem>>, vector<1x1x8xf32>
    %93 = vector.shape_cast %92 : vector<1x1x8xf32> to vector<1x8xf32>
    %94 = vector.broadcast %93 : vector<1x8xf32> to vector<8x8xf32>
    %95 = arith.addf %91, %94 : vector<8x8xf32>
    %cst_79 = arith.constant 0.000000e+00 : f32
    %96 = vector.broadcast %cst_79 : f32 to vector<8x8xf32>
    %97 = arith.maximumf %95, %96 : vector<8x8xf32>
    %c3_80 = arith.constant 3 : index
    %c0_81 = arith.constant 0 : index
    %c0_82 = arith.constant 0 : index
    %98 = vector.load %arg9[%c3_80, %c0_81, %c0_82] : memref<4x1x8xf32, #tpu.memory_space<vmem>>, vector<1x1x8xf32>
    %99 = vector.shape_cast %98 : vector<1x1x8xf32> to vector<1x8xf32>
    %100 = vector.broadcast %99 : vector<1x8xf32> to vector<8x8xf32>
    %101 = arith.mulf %97, %100 : vector<8x8xf32>
    %cst_83 = arith.constant dense<0.000000e+00> : vector<8xf32>
    %102 = vector.multi_reduction <add>, %101, %cst_83 [1] : vector<8x8xf32> to vector<8xf32>
    %103 = vector.shape_cast %102 : vector<8xf32> to vector<8x1xf32>
    %104 = arith.addf %78, %103 : vector<8x1xf32>
    %c0_84 = arith.constant 0 : index
    %105 = memref.load %arg10[%c0_84] : memref<1xf32, #tpu.memory_space<smem>>
    %106 = vector.broadcast %105 : f32 to vector<8x1xf32>
    %107 = arith.addf %104, %106 : vector<8x1xf32>
    %108 = arith.negf %107 : vector<8x1xf32>
    %109 = math.exp %108 : vector<8x1xf32>
    %cst_85 = arith.constant 1.000000e+00 : f32
    %110 = vector.broadcast %cst_85 : f32 to vector<8x1xf32>
    %111 = arith.addf %110, %109 : vector<8x1xf32>
    %112 = arith.divf %110, %111 : vector<8x1xf32>
    %c0_86 = arith.constant 0 : index
    %c0_87 = arith.constant 0 : index
    %113 = vector.load %arg11[%c0_86, %c0_87] : memref<8x1xf32, #tpu.memory_space<vmem>>, vector<8x1xf32>
    tpu.vector_store %arg11[%c0_86, %c0_87], %112 {strides = array<i32>} : memref<8x1xf32, #tpu.memory_space<vmem>>, vector<8x1xf32>,
    return
  }
  func.func @transform_0(%arg0: i32) -> (i32, i32) {
    %c0_i32 = arith.constant 0 : i32
    %c0_i32_0 = arith.constant 0 : i32
    return %arg0, %c0_i32 : i32, i32
  }
  func.func @transform_1(%arg0: i32) -> (i32, i32) {
    %c0_i32 = arith.constant 0 : i32
    %c0_i32_0 = arith.constant 0 : i32
    return %arg0, %c0_i32 : i32, i32
  }
  func.func @transform_2(%arg0: i32) -> (i32, i32) {
    %c0_i32 = arith.constant 0 : i32
    %c0_i32_0 = arith.constant 0 : i32
    return %arg0, %c0_i32 : i32, i32
  }
  func.func @transform_3(%arg0: i32) -> (i32, i32) {
    %c0_i32 = arith.constant 0 : i32
    %c0_i32_0 = arith.constant 0 : i32
    return %arg0, %c0_i32 : i32, i32
  }
  func.func @transform_4(%arg0: i32) -> (i32, i32, i32) {
    %c0_i32 = arith.constant 0 : i32
    %c0_i32_0 = arith.constant 0 : i32
    %c0_i32_1 = arith.constant 0 : i32
    %c0_i32_2 = arith.constant 0 : i32
    return %c0_i32, %c0_i32_0, %c0_i32_1 : i32, i32, i32
  }
  func.func @transform_5(%arg0: i32) -> (i32, i32, i32) {
    %c0_i32 = arith.constant 0 : i32
    %c0_i32_0 = arith.constant 0 : i32
    %c0_i32_1 = arith.constant 0 : i32
    %c0_i32_2 = arith.constant 0 : i32
    return %c0_i32, %c0_i32_0, %c0_i32_1 : i32, i32, i32
  }
  func.func @transform_6(%arg0: i32) -> (i32, i32, i32) {
    %c0_i32 = arith.constant 0 : i32
    %c0_i32_0 = arith.constant 0 : i32
    %c0_i32_1 = arith.constant 0 : i32
    %c0_i32_2 = arith.constant 0 : i32
    return %c0_i32, %c0_i32_0, %c0_i32_1 : i32, i32, i32
  }
  func.func @transform_7(%arg0: i32) -> (i32, i32, i32) {
    %c0_i32 = arith.constant 0 : i32
    %c0_i32_0 = arith.constant 0 : i32
    %c0_i32_1 = arith.constant 0 : i32
    %c0_i32_2 = arith.constant 0 : i32
    return %c0_i32, %c0_i32_0, %c0_i32_1 : i32, i32, i32
  }
  func.func @transform_8(%arg0: i32) -> (i32, i32, i32) {
    %c0_i32 = arith.constant 0 : i32
    %c0_i32_0 = arith.constant 0 : i32
    %c0_i32_1 = arith.constant 0 : i32
    %c0_i32_2 = arith.constant 0 : i32
    return %c0_i32, %c0_i32_0, %c0_i32_1 : i32, i32, i32
  }
  func.func @transform_9(%arg0: i32) -> i32 {
    %c0_i32 = arith.constant 0 : i32
    %c0_i32_0 = arith.constant 0 : i32
    return %c0_i32 : i32
  }
  func.func @transform_10(%arg0: i32) -> (i32, i32) {
    %c0_i32 = arith.constant 0 : i32
    %c0_i32_0 = arith.constant 0 : i32
    return %arg0, %c0_i32 : i32, i32
  }
}

</mosaic_0001>

<bundles_post_ra>
// kernel: tpu_custom_call.1
= control target key start
LH: loop header
LB: loop body
LE: loop exit
PB: predicated region body
PF: predicated region fallthrough
CT: control target
= control target key end

     0   :  { %v988_v0 = vmov 0.0|0.0   ;;  %vm989_vm0 = vmmov 0   ;;  %v990_v4 = vmov 0.0   ;;  %vm48_vm1 = vcmask 261120   ;;  %s1212_s4 = inlined_call_operand.vmem [shape: f32[4,32,16], index: 4, kind: input, shape index: {}]   ;;  %s1213_s0 = inlined_call_operand.vmem [shape: f32[8,32], index: 0, kind: input, shape index: {}]   ;;  %s1214_s6 = inlined_call_operand.vmem [shape: f32[4,16,8], index: 6, kind: input, shape index: {}]   ;;  %s1215_s5 = inlined_call_operand.vmem [shape: f32[4,1,16], index: 5, kind: input, shape index: {}]   ;;  %s1216_s1 = inlined_call_operand.vmem [shape: f32[8,32], index: 1, kind: input, shape index: {}]   ;;  %s1217_s7 = inlined_call_operand.vmem [shape: f32[4,1,8], index: 7, kind: input, shape index: {}]   ;;  %s1218_s8 = inlined_call_operand.vmem [shape: f32[4,1,8], index: 8, kind: input, shape index: {}]   ;;  %s1219_s2 = inlined_call_operand.vmem [shape: f32[8,32], index: 2, kind: input, shape index: {}]   ;;  %s1220_s3 = inlined_call_operand.vmem [shape: f32[8,32], index: 3, kind: input, shape index: {}]   ;;  %s1221_s9 = inlined_call_operand.<no memory space> [shape: f32[1], index: 9, kind: input, shape index: {}]   ;;  %s1222_s10 = inlined_call_operand.vmem [shape: f32[8,1], index: 10, kind: output, shape index: {}]  }
   0x1   :  { %945 = vmatprep.subr.bf16.mxu0 %v988_v0  ;;  %v37_v1 = vld [vmem:[%s1212_s4] sm:$0xff]  ;;  %v38_v2 = vld [vmem:[%s1212_s4 + $0x8] sm:$0xff]  ;;  %v39_v3 = vld [vmem:[%s1212_s4 + $0x10] sm:$0xff]  ;;  %881 = vmatprep.mubr.msk.f32.mxu0 %vm989_vm0, %v990_v4  ;;  %vm132_vm2 = vcmask 130048   ;;  %vm215_vm3 = vcmask 64512   ;;  %vm787_vm4 = vcmask 7168  }
   0x2   :  { %v946_v5 = vpack.c.bf16 %v38_v2, %v37_v1  ;;  %v40_v6 = vld [vmem:[%s1212_s4 + $0x18] sm:$0xff]  ;;  %951 = vmatprep.subr.bf16.mxu1 %v988_v0  ;;  %888 = vmatprep.mubr.msk.f32.mxu1 %vm989_vm0, %v990_v4  ;;  %v36_v8 = vld [vmem:[%s1213_s0] sm:$0xff]  ;;  %v124_v10 = vld [vmem:[%s1214_s6 + $0x8] sm:$0xff] }
   0x3   :  { %v949_v7 = vpack.c.bf16 %v40_v6, %v39_v3  ;;  %v123_v9 = vld [vmem:[%s1214_s6] sm:$0xff]  ;;  %v799_v14 = vld [vmem:[%s1212_s4 + $0x28] sm:$0xff]  ;;  %v800_v20 = vld [vmem:[%s1212_s4 + $0x30] sm:$0xff] }
   0x4   :  { %947 = vmatpush3.bf16.msra.mxu0 %v946_v5  ;;  %v952_v11 = vpack.c.bf16 %v124_v10, %v123_v9  ;;  %v793_v12 = vld [vmem:[%s1215_s5] ss:$0 sm:$0xff]  ;;  %v801_v21 = vld [vmem:[%s1212_s4 + $0x38] sm:$0xff]  ;;  %v805_v24 = vld [vmem:[%s1214_s6 + $0x10] sm:$0xff] }
   0x5   :  { %948 = vmatprep.subr.bf16.mxu0 %v988_v0  ;;  %v798_v13 = vld [vmem:[%s1212_s4 + $0x20] sm:$0xff]  ;;  %v958_v22 = vpack.c.bf16 %v801_v21, %v800_v20  ;;  %v806_v25 = vld [vmem:[%s1214_s6 + $0x18] sm:$0xff]  ;;  %v813_v37 = vld [vmem:[%s1212_s4 + $0x48] sm:$0xff] }
   0x6   :  { %953 = vmatpush3.bf16.msra.mxu1 %v952_v11  ;;  %v955_v18 = vpack.c.bf16 %v799_v14, %v798_v13  ;;  %v220_v23 = vld [vmem:[%s1216_s1] sm:$0xff]  ;;  %v961_v26 = vpack.c.bf16 %v806_v25, %v805_v24  ;;  %v814_v43 = vld [vmem:[%s1212_s4 + $0x50] sm:$0xff]  ;;  %v815_v44 = vld [vmem:[%s1212_s4 + $0x58] sm:$0xff] }
   0x7   :  { %954 = vmatprep.subr.bf16.mxu1 %v988_v0  ;;  %v795_v27 = vld [vmem:[%s1217_s7] ss:$0 sm:$0xff]  ;;  %v803_v34 = vld [vmem:[%s1215_s5 + $0x1] ss:$0 sm:$0xff]  ;;  %v967_v45 = vpack.c.bf16 %v815_v44, %v814_v43  ;;  %v820_v48 = vld [vmem:[%s1214_s6 + $0x28] sm:$0xff] }
   0x8   :  { %950 = vmatpush3.bf16.msra.mxu0 %v949_v7  ;;  %v797_v31 = vld [vmem:[%s1218_s8] ss:$0 sm:$0xff]  ;;  %v808_v50 = vld [vmem:[%s1217_s7 + $0x1] ss:$0 sm:$0xff]  ;;  %v817_v57 = vld [vmem:[%s1215_s5 + $0x2] ss:$0 sm:$0xff] }
   0x9   :  { %960 = vmatprep.subr.bf16.mxu0 %v988_v0  ;;  %v812_v36 = vld [vmem:[%s1212_s4 + $0x40] sm:$0xff]  ;;  %v827_v60 = vld [vmem:[%s1212_s4 + $0x68] sm:$0xff]  ;;  %v828_v3 = vld [vmem:[%s1212_s4 + $0x70] sm:$0xff] }
   0xa   :  { %v964_v41 = vpack.c.bf16 %v813_v37, %v812_v36  ;;  %v406_v46 = vld [vmem:[%s1219_s2] sm:$0xff]  ;;  %v829_v5 = vld [vmem:[%s1212_s4 + $0x78] sm:$0xff] }
   0xb   :  { %882 = vmatmul.mubr.msk.f32.vlgmr.msra.gmra.mrb[0].mxu0 %vm48_vm1, %v36_v8  ;;  %v819_v47 = vld [vmem:[%s1214_s6 + $0x20] sm:$0xff]  ;;  %v976_v6 = vpack.c.bf16 %v829_v5, %v828_v3  ;;  %v833_v8 = vld [vmem:[%s1214_s6 + $0x30] sm:$0xff]  ;;  %v834_v9 = vld [vmem:[%s1214_s6 + $0x38] sm:$0xff] }
   0xc   :  { %906 = vmatprep.mubr.msk.f32.mxu0 %vm989_vm0, %v990_v4  ;;  %962 = vmatpush3.bf16.msra.mxu0 %v961_v26  ;;  %v970_v49 = vpack.c.bf16 %v820_v48, %v819_v47  ;;  %v811_v54 = vld [vmem:[%s1218_s8 + $0x1] ss:$0 sm:$0xff]  ;;  %v979_v10 = vpack.c.bf16 %v834_v9, %v833_v8  ;;  %v825_v13 = vld [vmem:[%s1218_s8 + $0x2] ss:$0 sm:$0xff]  ;;  %v839_v26 = vld [vmem:[%s1218_s8 + $0x3] ss:$0 sm:$0xff] }
   0xd   :  { %963 = vmatprep.subr.bf16.mxu0 %v988_v0  ;;  %v826_v59 = vld [vmem:[%s1212_s4 + $0x60] sm:$0xff] }
   0xe   :  { %v973_v1 = vpack.c.bf16 %v827_v60, %v826_v59  ;;  %v592_v7 = vld [vmem:[%s1220_s3] sm:$0xff] }
  0xde   :  { %v118_v15 = vpop.f32.mrb[0].mxu0 }
  0xdf   :  { %v119_v16 = vadd.f32 %v793_v12, %v118_v15  ;;  %v883_v17 = vpop.f32.mrb[1].mxu0 }
  0xe1   :  { %v122_v19 = vmax.f32 %v119_v16, 0.0  ;;  %v831_v16 = vld [vmem:[%s1215_s5 + $0x3] ss:$0 sm:$0xff] }
  0xe3   :  { %889 = vmatmul.mubr.msk.f32.vlgmr.msra.gmra.mrb[0].mxu1 %vm132_vm2, %v122_v19 }
  0xe4   :  { %956 = vmatpush3.bf16.msra.mxu1 %v955_v18  ;;  %899 = vmatprep.mubr.msk.f32.mxu1 %vm989_vm0, %v990_v4 }
  0xe5   :  { %957 = vmatprep.subr.bf16.mxu1 %v988_v0 }
  0xe8   :  { %959 = vmatpush3.bf16.msra.mxu1 %v958_v22  ;;  %v836_v22 = vld [vmem:[%s1217_s7 + $0x3] ss:$0 sm:$0xff] }
  0xe9   :  { %969 = vmatprep.subr.bf16.mxu1 %v988_v0 }
  0xeb   :  { %900 = vmatmul.mubr.msk.f32.vlgmr.msra.gmra.mrb[2].mxu1 %vm48_vm1, %v220_v23 }
  0xec   :  { %924 = vmatprep.mubr.msk.f32.mxu1 %vm989_vm0, %v990_v4  ;;  %971 = vmatpush3.bf16.msra.mxu1 %v970_v49 }
  0xed   :  { %972 = vmatprep.subr.bf16.mxu1 %v988_v0 }
 0x1b6   :  { %v202_v28 = vpop.f32.mrb[0].mxu1 }
 0x1b7   :  { %v203_v29 = vadd.f32 %v795_v27, %v202_v28  ;;  %v890_v30 = vpop.f32.mrb[1].mxu1 }
 0x1b9   :  { %v206_v32 = vmax.f32 %v203_v29, 0.0 }
 0x1bb   :  { %v214_v33 = vmul.f32 %v797_v31, %v206_v32 }
 0x1bd   :  { %v216_v35 = vsel %vm215_vm3, %v214_v33, 0.0 }
 0x1be   :  { %v303_v38 = vpop.f32.mrb[2].mxu1  ;;  %217 = vadd.xlane.f32.xlu0 %v216_v35  ;;  %v779_v35 = vstv %s1221_s9 }
 0x1bf   :  { %v304_v39 = vadd.f32 %v803_v34, %v303_v38  ;;  %v901_v40 = vpop.f32.mrb[3].mxu1 }
 0x1c1   :  { %v307_v42 = vmax.f32 %v304_v39, 0.0 }
 0x1c3   :  { %907 = vmatmul.mubr.msk.f32.vlgmr.msra.gmra.mrb[2].mxu0 %vm132_vm2, %v307_v42 }
 0x1c4   :  { %965 = vmatpush3.bf16.msra.mxu0 %v964_v41  ;;  %917 = vmatprep.mubr.msk.f32.mxu0 %vm989_vm0, %v990_v4 }
 0x1c5   :  { %966 = vmatprep.subr.bf16.mxu0 %v988_v0 }
 0x1c8   :  { %968 = vmatpush3.bf16.msra.mxu0 %v967_v45 }
 0x1c9   :  { %978 = vmatprep.subr.bf16.mxu0 %v988_v0 }
 0x1cb   :  { %918 = vmatmul.mubr.msk.f32.vlgmr.msra.gmra.mrb[4].mxu0 %vm48_vm1, %v406_v46 }
 0x1cc   :  { %942 = vmatprep.mubr.msk.f32.mxu0 %vm989_vm0, %v990_v4  ;;  %980 = vmatpush3.bf16.msra.mxu0 %v979_v10 }
 0x24b   :  { %v218_v30 = vpop.xlane.xlu0 %217 }
 0x296   :  { %v388_v51 = vpop.f32.mrb[2].mxu0 }
 0x297   :  { %v389_v52 = vadd.f32 %v808_v50, %v388_v51  ;;  %v908_v53 = vpop.f32.mrb[3].mxu0 }
 0x299   :  { %v392_v55 = vmax.f32 %v389_v52, 0.0 }
 0x29b   :  { %v401_v56 = vmul.f32 %v811_v54, %v392_v55 }
 0x29d   :  { %v402_v58 = vsel %vm215_vm3, %v401_v56, 0.0 }
 0x29e   :  { %v489_v61 = vpop.f32.mrb[4].mxu0  ;;  %403 = vadd.xlane.f32.xlu0 %v402_v58 }
 0x29f   :  { %v490_v62 = vadd.f32 %v817_v57, %v489_v61  ;;  %v919_v63 = vpop.f32.mrb[5].mxu0 }
 0x2a1   :  { %v493_v2 = vmax.f32 %v490_v62, 0.0 }
 0x2a3   :  { %925 = vmatmul.mubr.msk.f32.vlgmr.msra.gmra.mrb[4].mxu1 %vm132_vm2, %v493_v2 }
 0x2a4   :  { %974 = vmatpush3.bf16.msra.mxu1 %v973_v1  ;;  %935 = vmatprep.mubr.msk.f32.mxu1 %vm989_vm0, %v990_v4 }
 0x2a5   :  { %975 = vmatprep.subr.bf16.mxu1 %v988_v0  ;;  %v822_v0 = vld [vmem:[%s1217_s7 + $0x2] ss:$0 sm:$0xff] }
 0x2a8   :  { %977 = vmatpush3.bf16.msra.mxu1 %v976_v6 }
 0x2ab   :  { %936 = vmatmul.mubr.msk.f32.vlgmr.msra.gmra.mrb[6].mxu1 %vm48_vm1, %v592_v7 }
 0x32b   :  { %v404_v31 = vpop.xlane.xlu0 %403 }
 0x32c   :  { %v405_v33 = vadd.f32 %v404_v31, %v218_v30 }
 0x376   :  { %v574_v4 = vpop.f32.mrb[4].mxu1 }
 0x377   :  { %v575_v11 = vadd.f32 %v822_v0, %v574_v4  ;;  %v926_v12 = vpop.f32.mrb[5].mxu1 }
 0x379   :  { %v578_v14 = vmax.f32 %v575_v11, 0.0 }
 0x37b   :  { %v587_v15 = vmul.f32 %v825_v13, %v578_v14 }
 0x37d   :  { %v588_v17 = vsel %vm215_vm3, %v587_v15, 0.0 }
 0x37e   :  { %v675_v18 = vpop.f32.mrb[6].mxu1  ;;  %589 = vadd.xlane.f32.xlu1 %v588_v17 }
 0x37f   :  { %v676_v19 = vadd.f32 %v831_v16, %v675_v18  ;;  %v937_v20 = vpop.f32.mrb[7].mxu1 }
 0x381   :  { %v679_v21 = vmax.f32 %v676_v19, 0.0 }
 0x383   :  { %943 = vmatmul.mubr.msk.f32.vlgmr.msra.gmra.mrb[6].mxu0 %vm132_vm2, %v679_v21 }
 0x40b   :  { %v590_v32 = vpop.xlane.xlu1 %589 }
 0x40c   :  { %v591_v34 = vadd.f32 %v590_v32, %v405_v33 }
 0x456   :  { %v760_v23 = vpop.f32.mrb[6].mxu0 }
 0x457   :  { %v761_v24 = vadd.f32 %v836_v22, %v760_v23  ;;  %v944_v25 = vpop.f32.mrb[7].mxu0 }
 0x459   :  { %v764_v27 = vmax.f32 %v761_v24, 0.0 }
 0x45b   :  { %v773_v28 = vmul.f32 %v839_v26, %v764_v27 }
 0x45d   :  { %v774_v29 = vsel %vm215_vm3, %v773_v28, 0.0 }
 0x45e   :  { %775 = vadd.xlane.f32.xlu1 %v774_v29 }
 0x4eb   :  { %v776_v36 = vpop.xlane.xlu1 %775 }
 0x4ec   :  { %v777_v37 = vadd.f32 %v776_v36, %v591_v34 }
 0x4ee   :  { %v780_v38 = vadd.f32 %v779_v35, %v777_v37 }
 0x4f0   :  { %v840_v39 = vmul.f32 -1.442695, %v780_v38 }
 0x4f2   :  { %984 = vpow2.f32 %v840_v39 }
 0x4fc   :  { %v985_v40 = vpop.eup %984 }
 0x4fd   :  { %v784_v41 = vadd.f32 1.0, %v985_v40 }
 0x4ff   :  { %986 = vrcp.f32 %v784_v41 }
 0x509   :  { %v987_v42 = vpop.eup %986 }
 0x50a   :  { %788 = vst.msk [vmem:[%s1222_s10] sm:$0xff] %vm787_vm4, %v987_v42 }

</bundles_post_ra>
